<compile_context>
chip_gen: v7x
topology: tpu7x:2x2x1
jax: 0.10.0
libtpu: 0.0.40
codegen_flags: <defaults>
</compile_context>

<pallas_src>
import functools

import jax
import jax.numpy as jnp
from jax.experimental import pallas as pl
from jax.experimental.pallas import tpu as pltpu


def _topk_indices_kernel(s_ref, idx_ref, *, k):
    """Per-row indices of the k smallest scores, in ascending index order."""
    b, n = s_ref.shape
    s = s_ref[...].astype(jnp.float32)                      # (B, N)
    col = jax.lax.broadcasted_iota(jnp.int32, (b, n), 1)    # (B, N)

    # ---- k rounds of masked arg-min (ties -> lowest index) over all batches ----
    taken = jnp.zeros((b, n), dtype=jnp.bool_)
    for _ in range(k):
        masked = jnp.where(taken, jnp.inf, s)
        mval = jnp.min(masked, axis=-1, keepdims=True)                          # (B, 1)
        first = jnp.min(jnp.where(masked == mval, col, n), axis=-1, keepdims=True)
        taken = jnp.logical_or(taken, col == first)

    # ---- emit the selected indices in ascending order (k more lane-min rounds) ----
    remaining = taken
    picks = []
    for _ in range(k):
        nxt = jnp.min(jnp.where(remaining, col, n), axis=-1, keepdims=True)     # (B, 1)
        picks.append(nxt)
        remaining = jnp.logical_and(remaining, col != nxt)
    idx = jnp.concatenate(picks, axis=-1)                   # (B, k), ascending
    # Clamp for safety (only hit if scores contain NaN and fewer than k picked).
    idx_ref[...] = jnp.minimum(idx, n - 1).astype(jnp.int32)


def _gather_kernel(idx_ref, v_ref, e_ref, nodes_ref, edges_ref, *, k):
    # grid = (B, k); step = (b, i)
    #   idx_ref   : SMEM (B, k) int32 (scalar-prefetched)
    #   v_ref     : (1, N, C)    -- v_feat[b]            (DMA'd once per batch)
    #   e_ref     : (1, 1, N, E) -- edge[b, idx[b, i]]   (only k rows per batch)
    #   nodes_ref : (1, k, C)    -- nodes[b]   (block resident across the i axis)
    #   edges_ref : (1, 1, k, E) -- edges[b, i]
    b = pl.program_id(0)
    i = pl.program_id(1)

    # nodes[b, i, :] = v_feat[b, idx[b, i], :]   (bit-exact row copy)
    nodes_ref[0, pl.ds(i, 1), :] = v_ref[0, pl.ds(idx_ref[b, i], 1), :]

    # edges[b, i, j, :] = edge[b, idx[b, i], idx[b, j], :]
    rows = [e_ref[0, 0, pl.ds(idx_ref[b, j], 1), :] for j in range(k)]
    edges_ref[0, 0] = jnp.concatenate(rows, axis=0)         # one (k, E) store


def select_topk_forward(obj_similarity, obj_mmt_in, obj_obj_edge_feat, k):
    """Pallas implementation of Select_Topk.forward (obj branch)."""
    B, N = obj_similarity.shape
    _, _, C = obj_mmt_in.shape
    E = obj_obj_edge_feat.shape[-1]

    # ---- kernel 1: sorted top-k-smallest indices ----
    indices = pl.pallas_call(
        functools.partial(_topk_indices_kernel, k=k),
        out_shape=jax.ShapeDtypeStruct((B, k), jnp.int32),
    )(obj_similarity)

    # ---- kernel 2: index-based gather (indices scalar-prefetched into SMEM) ----
    grid_spec = pltpu.PrefetchScalarGridSpec(
        num_scalar_prefetch=1,
        grid=(B, k),
        in_specs=[
            # v_feat[b]: full (N, C) block, re-used across the i axis (one DMA / batch)
            pl.BlockSpec((1, N, C), lambda b, i, idx: (b, 0, 0)),
            # edge[b, idx[b, i]]: only the selected (N, E) row-slab is DMA'd
            pl.BlockSpec((1, 1, N, E), lambda b, i, idx: (b, idx[b, i], 0, 0)),
        ],
        out_specs=(
            # nodes[b]: resident across i; row i written each step
            pl.BlockSpec((1, k, C), lambda b, i, idx: (b, 0, 0)),
            # edges[b, i]: one lane-dense (k, E) slab per step
            pl.BlockSpec((1, 1, k, E), lambda b, i, idx: (b, i, 0, 0)),
        ),
    )
    nodes, edges = pl.pallas_call(
        functools.partial(_gather_kernel, k=k),
        out_shape=(
            jax.ShapeDtypeStruct((B, k, C), obj_mmt_in.dtype),
            jax.ShapeDtypeStruct((B, k, k, E), obj_obj_edge_feat.dtype),
        ),
        grid_spec=grid_spec,
        compiler_params=pltpu.CompilerParams(
            dimension_semantics=("parallel", "arbitrary")),
    )(indices, obj_mmt_in, obj_obj_edge_feat)

    # Constant non-pad mask: produced in the wrapper (free after constant folding).
    mask = jnp.ones((B, k), jnp.float32)
    return nodes, edges, mask


def _reference_forward(scores, v_feat, edge, k):
    """Pure-JAX reference mirroring the PyTorch module."""
    idx = jax.lax.top_k(-scores, k)[1]          # k smallest (largest=False)
    idx = jnp.sort(idx, axis=-1)                # sorted indices, like torch.sort(...).values
    nodes = jnp.take_along_axis(v_feat, idx[:, :, None], axis=1)
    e1 = jnp.take_along_axis(edge, idx[:, :, None, None], axis=1)
    e2 = jnp.take_along_axis(e1, idx[:, None, :, None], axis=2)
    mask = jnp.ones((scores.shape[0], k), jnp.float32)
    return nodes, e2, mask


if __name__ == "__main__":
    B, N, C, E, K = 2, 16, 32, 16, 4   # config.obj_k = 4

    key = jax.random.PRNGKey(0)
    k1, k2, k3 = jax.random.split(key, 3)
    obj_similarity = jax.random.normal(k1, (B, N), jnp.float32)       # fwd_results['obj_similarity']
    obj_mmt_in = jax.random.normal(k2, (B, N, C), jnp.float32)        # fwd_results['obj_mmt_in']
    obj_obj_edge = jax.random.normal(k3, (B, N, N, E), jnp.float32)   # sample_list['obj_obj_edge_feat']

    nodes, edges, mask = select_topk_forward(obj_similarity, obj_mmt_in, obj_obj_edge, K)
    jax.block_until_ready((nodes, edges, mask))

    ref_nodes, ref_edges, ref_mask = _reference_forward(obj_similarity, obj_mmt_in, obj_obj_edge, K)
    assert nodes.shape == (B, K, C) and edges.shape == (B, K, K, E) and mask.shape == (B, K)
    # Gather path is bit-exact (no MXU), so exact comparison is valid.
    assert jnp.array_equal(nodes, ref_nodes)
    assert jnp.array_equal(edges, ref_edges)
    assert jnp.array_equal(mask, ref_mask)

    print("KERNEL_OK")
</pallas_src>

<mosaic_0001>
module attributes {stable_mosaic.version = 11 : i64} {
  func.func @_topk_indices_kernel(%arg0: memref<2x16xf32, #tpu.memory_space<vmem>>, %arg1: memref<2x4xi32, #tpu.memory_space<vmem>>) attributes {dimension_semantics = [], scalar_prefetch = 0 : i64, scratch_operands = 0 : i64, tpu.core_type = #tpu.core_type<tc>} {
    %c0 = arith.constant 0 : index
    %c0_0 = arith.constant 0 : index
    %0 = vector.load %arg0[%c0, %c0_0] : memref<2x16xf32, #tpu.memory_space<vmem>>, vector<2x16xf32>
    %1 = tpu.iota {dimensions = array<i32: 1>} : vector<2x16xi32>
    %false = arith.constant false
    %2 = vector.broadcast %false : i1 to vector<2x16xi1>
    %cst = arith.constant 0x7F800000 : f32
    %3 = vector.broadcast %cst : f32 to vector<2x16xf32>
    %4 = arith.select %2, %3, %0 : vector<2x16xi1>, vector<2x16xf32>
    %cst_1 = arith.constant dense<0x7F800000> : vector<2xf32>
    %5 = vector.multi_reduction <minimumf>, %4, %cst_1 [1] : vector<2x16xf32> to vector<2xf32>
    %6 = vector.shape_cast %5 : vector<2xf32> to vector<2x1xf32>
    %7 = vector.broadcast %6 : vector<2x1xf32> to vector<2x16xf32>
    %8 = arith.cmpf oeq, %4, %7 : vector<2x16xf32>
    %c16_i32 = arith.constant 16 : i32
    %9 = vector.broadcast %c16_i32 : i32 to vector<2x16xi32>
    %10 = arith.select %8, %1, %9 : vector<2x16xi1>, vector<2x16xi32>
    %cst_2 = arith.constant dense<2147483647> : vector<2xi32>
    %11 = vector.multi_reduction <minsi>, %10, %cst_2 [1] : vector<2x16xi32> to vector<2xi32>
    %12 = vector.shape_cast %11 : vector<2xi32> to vector<2x1xi32>
    %13 = vector.broadcast %12 : vector<2x1xi32> to vector<2x16xi32>
    %14 = arith.cmpi eq, %1, %13 : vector<2x16xi32>
    %15 = arith.ori %2, %14 : vector<2x16xi1>
    %cst_3 = arith.constant 0x7F800000 : f32
    %16 = vector.broadcast %cst_3 : f32 to vector<2x16xf32>
    %17 = arith.select %15, %16, %0 : vector<2x16xi1>, vector<2x16xf32>
    %cst_4 = arith.constant dense<0x7F800000> : vector<2xf32>
    %18 = vector.multi_reduction <minimumf>, %17, %cst_4 [1] : vector<2x16xf32> to vector<2xf32>
    %19 = vector.shape_cast %18 : vector<2xf32> to vector<2x1xf32>
    %20 = vector.broadcast %19 : vector<2x1xf32> to vector<2x16xf32>
    %21 = arith.cmpf oeq, %17, %20 : vector<2x16xf32>
    %c16_i32_5 = arith.constant 16 : i32
    %22 = vector.broadcast %c16_i32_5 : i32 to vector<2x16xi32>
    %23 = arith.select %21, %1, %22 : vector<2x16xi1>, vector<2x16xi32>
    %cst_6 = arith.constant dense<2147483647> : vector<2xi32>
    %24 = vector.multi_reduction <minsi>, %23, %cst_6 [1] : vector<2x16xi32> to vector<2xi32>
    %25 = vector.shape_cast %24 : vector<2xi32> to vector<2x1xi32>
    %26 = vector.broadcast %25 : vector<2x1xi32> to vector<2x16xi32>
    %27 = arith.cmpi eq, %1, %26 : vector<2x16xi32>
    %28 = arith.ori %15, %27 : vector<2x16xi1>
    %cst_7 = arith.constant 0x7F800000 : f32
    %29 = vector.broadcast %cst_7 : f32 to vector<2x16xf32>
    %30 = arith.select %28, %29, %0 : vector<2x16xi1>, vector<2x16xf32>
    %cst_8 = arith.constant dense<0x7F800000> : vector<2xf32>
    %31 = vector.multi_reduction <minimumf>, %30, %cst_8 [1] : vector<2x16xf32> to vector<2xf32>
    %32 = vector.shape_cast %31 : vector<2xf32> to vector<2x1xf32>
    %33 = vector.broadcast %32 : vector<2x1xf32> to vector<2x16xf32>
    %34 = arith.cmpf oeq, %30, %33 : vector<2x16xf32>
    %c16_i32_9 = arith.constant 16 : i32
    %35 = vector.broadcast %c16_i32_9 : i32 to vector<2x16xi32>
    %36 = arith.select %34, %1, %35 : vector<2x16xi1>, vector<2x16xi32>
    %cst_10 = arith.constant dense<2147483647> : vector<2xi32>
    %37 = vector.multi_reduction <minsi>, %36, %cst_10 [1] : vector<2x16xi32> to vector<2xi32>
    %38 = vector.shape_cast %37 : vector<2xi32> to vector<2x1xi32>
    %39 = vector.broadcast %38 : vector<2x1xi32> to vector<2x16xi32>
    %40 = arith.cmpi eq, %1, %39 : vector<2x16xi32>
    %41 = arith.ori %28, %40 : vector<2x16xi1>
    %cst_11 = arith.constant 0x7F800000 : f32
    %42 = vector.broadcast %cst_11 : f32 to vector<2x16xf32>
    %43 = arith.select %41, %42, %0 : vector<2x16xi1>, vector<2x16xf32>
    %cst_12 = arith.constant dense<0x7F800000> : vector<2xf32>
    %44 = vector.multi_reduction <minimumf>, %43, %cst_12 [1] : vector<2x16xf32> to vector<2xf32>
    %45 = vector.shape_cast %44 : vector<2xf32> to vector<2x1xf32>
    %46 = vector.broadcast %45 : vector<2x1xf32> to vector<2x16xf32>
    %47 = arith.cmpf oeq, %43, %46 : vector<2x16xf32>
    %c16_i32_13 = arith.constant 16 : i32
    %48 = vector.broadcast %c16_i32_13 : i32 to vector<2x16xi32>
    %49 = arith.select %47, %1, %48 : vector<2x16xi1>, vector<2x16xi32>
    %cst_14 = arith.constant dense<2147483647> : vector<2xi32>
    %50 = vector.multi_reduction <minsi>, %49, %cst_14 [1] : vector<2x16xi32> to vector<2xi32>
    %51 = vector.shape_cast %50 : vector<2xi32> to vector<2x1xi32>
    %52 = vector.broadcast %51 : vector<2x1xi32> to vector<2x16xi32>
    %53 = arith.cmpi eq, %1, %52 : vector<2x16xi32>
    %54 = arith.ori %41, %53 : vector<2x16xi1>
    %c16_i32_15 = arith.constant 16 : i32
    %55 = vector.broadcast %c16_i32_15 : i32 to vector<2x16xi32>
    %56 = arith.select %54, %1, %55 : vector<2x16xi1>, vector<2x16xi32>
    %cst_16 = arith.constant dense<2147483647> : vector<2xi32>
    %57 = vector.multi_reduction <minsi>, %56, %cst_16 [1] : vector<2x16xi32> to vector<2xi32>
    %58 = vector.shape_cast %57 : vector<2xi32> to vector<2x1xi32>
    %59 = vector.broadcast %58 : vector<2x1xi32> to vector<2x16xi32>
    %60 = arith.cmpi ne, %1, %59 : vector<2x16xi32>
    %61 = arith.andi %54, %60 : vector<2x16xi1>
    %c16_i32_17 = arith.constant 16 : i32
    %62 = vector.broadcast %c16_i32_17 : i32 to vector<2x16xi32>
    %63 = arith.select %61, %1, %62 : vector<2x16xi1>, vector<2x16xi32>
    %cst_18 = arith.constant dense<2147483647> : vector<2xi32>
    %64 = vector.multi_reduction <minsi>, %63, %cst_18 [1] : vector<2x16xi32> to vector<2xi32>
    %65 = vector.shape_cast %64 : vector<2xi32> to vector<2x1xi32>
    %66 = vector.broadcast %65 : vector<2x1xi32> to vector<2x16xi32>
    %67 = arith.cmpi ne, %1, %66 : vector<2x16xi32>
    %68 = arith.andi %61, %67 : vector<2x16xi1>
    %c16_i32_19 = arith.constant 16 : i32
    %69 = vector.broadcast %c16_i32_19 : i32 to vector<2x16xi32>
    %70 = arith.select %68, %1, %69 : vector<2x16xi1>, vector<2x16xi32>
    %cst_20 = arith.constant dense<2147483647> : vector<2xi32>
    %71 = vector.multi_reduction <minsi>, %70, %cst_20 [1] : vector<2x16xi32> to vector<2xi32>
    %72 = vector.shape_cast %71 : vector<2xi32> to vector<2x1xi32>
    %73 = vector.broadcast %72 : vector<2x1xi32> to vector<2x16xi32>
    %74 = arith.cmpi ne, %1, %73 : vector<2x16xi32>
    %75 = arith.andi %68, %74 : vector<2x16xi1>
    %c16_i32_21 = arith.constant 16 : i32
    %76 = vector.broadcast %c16_i32_21 : i32 to vector<2x16xi32>
    %77 = arith.select %75, %1, %76 : vector<2x16xi1>, vector<2x16xi32>
    %cst_22 = arith.constant dense<2147483647> : vector<2xi32>
    %78 = vector.multi_reduction <minsi>, %77, %cst_22 [1] : vector<2x16xi32> to vector<2xi32>
    %79 = vector.shape_cast %78 : vector<2xi32> to vector<2x1xi32>
    %80 = tpu.concatenate %58, %65, %72, %79 in 1 : vector<2x1xi32>, vector<2x1xi32>, vector<2x1xi32>, vector<2x1xi32> -> vector<2x4xi32>
    %c15_i32 = arith.constant 15 : i32
    %81 = vector.broadcast %c15_i32 : i32 to vector<2x4xi32>
    %82 = arith.minsi %80, %81 : vector<2x4xi32>
    %c0_23 = arith.constant 0 : index
    %c0_24 = arith.constant 0 : index
    %83 = vector.load %arg1[%c0_23, %c0_24] : memref<2x4xi32, #tpu.memory_space<vmem>>, vector<2x4xi32>
    tpu.vector_store %arg1[%c0_23, %c0_24], %82 {strides = array<i32>} : memref<2x4xi32, #tpu.memory_space<vmem>>, vector<2x4xi32>,
    return
  }
}

</mosaic_0001>

<bundles_post_ra>
// kernel: tpu_custom_call.1
= control target key start
LH: loop header
LB: loop body
LE: loop exit
PB: predicated region body
PF: predicated region fallthrough
CT: control target
= control target key end

     0   :  { %6 = vsyncpa [#allocation3], 0  ;;  %s376_s0 = inlined_call_operand.hbm [shape: f32[2,16], index: 0, kind: input, shape index: {}]   ;;  %s377_s1 = inlined_call_operand.hbm [shape: s32[2,4], index: 1, kind: output, shape index: {}]  }
   0x1   :  { %7 = vsyncpa [#allocation4], 0  ;;  %s260_s6 = smov [#allocation2]   ;;  %s212_s10 = scalar_lea.hbm %s376_s0, 32 }
   0x2   :  { %s14_s7 = sshll.u32 %s260_s6, 4  ;;  %p213_p0 = scmp.ne.s32.totalorder %s376_s0, %s212_s10  ;;  %s15_s7 = int_to_ptr.vmem [resolvable:$true] %s14_s7 }
   0x3   :  { %p216_p1 = scmp.lt.u32.totalorder %s212_s10, %s376_s0 }
   0x5   :  { %p218_p2 = pnand %p216_p1, %p213_p0 }
   0x7   :  { %221 = shalt.err (!%p218_p2)
}
   0x8   :  { %s222_s15 = scalar_lea.vmem %s15_s7, 32  ;;  %p227_p4 = scmp.lt.s32.totalorder %s15_s7, %s15_s7 }
   0x9   :  { %p223_p3 = scmp.ne.s32.totalorder %s15_s7, %s222_s15  ;;  %p228_p5 = scmp.lt.s32.totalorder %s222_s15, %s222_s15 }
   0xb   :  { %p229_p6 = por %p228_p5, %p227_p4 }
   0xd   :  { %p230_p7 = pnand %p229_p6, %p223_p3 }
   0xf   :  { %233 = shalt.err (!%p230_p7)
}
  0x10   :  { %17 = dma.hbm_to_vmem [thread:$0]  %s376_s0, 32, %s15_s7, [#allocation3]  }
  0x11   :  { %256 = dma.done.wait [#allocation3], 32  }
  0x12   :  { %257 = vsyncadd [#allocation3], 4294967264  ;;  %vm24_vm0 = vcmask 123904   ;;  %v284_v0 = vld [vmem:[#allocation2] sm:$0x3]  ;;  %v22_v2 = vlaneseq  ;;  %s261_s0 = smov [#allocation5]  }
  0x13   :  { %v25_v1 = vsel %vm24_vm0, %v284_v0, inf  ;;  %s201_s18 = sshll.u32 %s261_s0, 4  ;;  %s202_s18 = int_to_ptr.vmem [resolvable:$true] %s201_s18 }
  0x14   :  { %26 = vmin.xlane.f32.xlu0 %v25_v1  ;;  %v288_v3 = vand.u32 127, %v22_v2  ;;  %s234_s19 = scalar_lea.vmem %s202_s18, 32  ;;  %p239_p9 = scmp.lt.s32.totalorder %s202_s18, %s202_s18 }
  0x15   :  { %p235_p8 = scmp.ne.s32.totalorder %s202_s18, %s234_s19  ;;  %p240_p10 = scmp.lt.s32.totalorder %s234_s19, %s234_s19 }
  0x17   :  { %p241_p11 = por %p240_p10, %p239_p9 }
  0x19   :  { %p242_p12 = pnand %p241_p11, %p235_p8 }
  0xa1   :  { %v27_v4 = vpop.xlane.xlu0 %26 }
  0xa2   :  { %vm28_vm1 = vcmp.eq.f32.partialorder %v284_v0, %v27_v4 }
  0xa3   :  { %v29_v5 = vsel %vm28_vm1, %v288_v3, 16 }
  0xa4   :  { %v30_v6 = vsel %vm24_vm0, %v29_v5, 2147483647 }
  0xa5   :  { %v32_v7 = vshra.s32 %v30_v6, 16  ;;  %v31_v9 = vand.u32 65535, %v30_v6 }
  0xa7   :  { %v34_v8 = vcvt.s32.f32 %v32_v7  ;;  %v33_v11 = vcvt.s32.f32 %v31_v9 }
  0xa9   :  { %35 = vmin.xlane.f32.xlu0 %v34_v8 }
 0x136   :  { %v36_v10 = vpop.xlane.xlu0 %35 }
 0x137   :  { %vm37_vm2 = vcmp.eq.f32.partialorder %v34_v8, %v36_v10  ;;  %v42_v13 = vcvt.f32.s32 %v36_v10 }
 0x138   :  { %v38_v12 = vsel %vm37_vm2, %v33_v11, inf }
 0x139   :  { %39 = vmin.xlane.f32.xlu1 %v38_v12  ;;  %v43_v15 = vshll.u32 %v42_v13, 16 }
 0x1c6   :  { %v40_v14 = vpop.xlane.xlu1 %39 }
 0x1c7   :  { %v41_v16 = vcvt.f32.s32 %v40_v14 }
 0x1c9   :  { %v44_v17 = vadd.s32 %v43_v15, %v41_v16 }
 0x1cb   :  { %vm45_vm3 = vcmp.eq.s32.totalorder %v288_v3, %v44_v17 }
 0x1cc   :  { %v46_v18 = vsel %vm45_vm3, inf, %v284_v0 }
 0x1cd   :  { %v47_v19 = vsel %vm24_vm0, %v46_v18, inf }
 0x1ce   :  { %48 = vmin.xlane.f32.xlu1 %v47_v19 }
 0x25b   :  { %v49_v20 = vpop.xlane.xlu1 %48 }
 0x25c   :  { %vm50_vm4 = vcmp.eq.f32.partialorder %v46_v18, %v49_v20 }
 0x25d   :  { %v51_v21 = vsel %vm50_vm4, %v288_v3, 16 }
 0x25e   :  { %v52_v22 = vsel %vm24_vm0, %v51_v21, 2147483647 }
 0x25f   :  { %v54_v23 = vshra.s32 %v52_v22, 16  ;;  %v53_v25 = vand.u32 65535, %v52_v22 }
 0x261   :  { %v56_v24 = vcvt.s32.f32 %v54_v23  ;;  %v55_v27 = vcvt.s32.f32 %v53_v25 }
 0x263   :  { %57 = vmin.xlane.f32.xlu0 %v56_v24 }
 0x2f0   :  { %v58_v26 = vpop.xlane.xlu0 %57 }
 0x2f1   :  { %vm59_vm5 = vcmp.eq.f32.partialorder %v56_v24, %v58_v26  ;;  %v64_v29 = vcvt.f32.s32 %v58_v26 }
 0x2f2   :  { %v60_v28 = vsel %vm59_vm5, %v55_v27, inf }
 0x2f3   :  { %61 = vmin.xlane.f32.xlu1 %v60_v28  ;;  %v65_v31 = vshll.u32 %v64_v29, 16 }
 0x380   :  { %v62_v30 = vpop.xlane.xlu1 %61 }
 0x381   :  { %v63_v32 = vcvt.f32.s32 %v62_v30 }
 0x383   :  { %v66_v33 = vadd.s32 %v65_v31, %v63_v32 }
 0x385   :  { %vm67_vm6 = vcmp.eq.s32.totalorder %v288_v3, %v66_v33 }
 0x386   :  { %vm303_vm7 = vmor %vm45_vm3, %vm67_vm6 }
 0x387   :  { %v69_v35 = vsel %vm303_vm7, inf, %v284_v0 }
 0x388   :  { %v70_v36 = vsel %vm24_vm0, %v69_v35, inf }
 0x389   :  { %71 = vmin.xlane.f32.xlu0 %v70_v36 }
 0x416   :  { %v72_v37 = vpop.xlane.xlu0 %71 }
 0x417   :  { %vm73_vm8 = vcmp.eq.f32.partialorder %v69_v35, %v72_v37 }
 0x418   :  { %v74_v38 = vsel %vm73_vm8, %v288_v3, 16  ;;  %vm185_vm8 = vcmask 7168  }
 0x419   :  { %v75_v39 = vsel %vm24_vm0, %v74_v38, 2147483647 }
 0x41a   :  { %v77_v40 = vshra.s32 %v75_v39, 16  ;;  %v76_v42 = vand.u32 65535, %v75_v39 }
 0x41c   :  { %v79_v41 = vcvt.s32.f32 %v77_v40  ;;  %v78_v44 = vcvt.s32.f32 %v76_v42 }
 0x41e   :  { %80 = vmin.xlane.f32.xlu1 %v79_v41 }
 0x4ab   :  { %v81_v43 = vpop.xlane.xlu1 %80 }
 0x4ac   :  { %vm82_vm9 = vcmp.eq.f32.partialorder %v79_v41, %v81_v43  ;;  %v87_v46 = vcvt.f32.s32 %v81_v43 }
 0x4ad   :  { %v83_v45 = vsel %vm82_vm9, %v78_v44, inf  ;;  %vm187_vm9 = vcmask 15360  }
 0x4ae   :  { %84 = vmin.xlane.f32.xlu0 %v83_v45  ;;  %v88_v48 = vshll.u32 %v87_v46, 16 }
 0x53b   :  { %v85_v47 = vpop.xlane.xlu0 %84 }
 0x53c   :  { %v86_v49 = vcvt.f32.s32 %v85_v47 }
 0x53e   :  { %v89_v50 = vadd.s32 %v88_v48, %v86_v49 }
 0x540   :  { %vm90_vm10 = vcmp.eq.s32.totalorder %v288_v3, %v89_v50 }
 0x541   :  { %vm316_vm11 = vmor %vm303_vm7, %vm90_vm10 }
 0x542   :  { %v92_v52 = vsel %vm316_vm11, inf, %v284_v0 }
 0x543   :  { %v93_v53 = vsel %vm24_vm0, %v92_v52, inf }
 0x544   :  { %94 = vmin.xlane.f32.xlu1 %v93_v53 }
 0x5d1   :  { %v95_v54 = vpop.xlane.xlu1 %94 }
 0x5d2   :  { %vm96_vm12 = vcmp.eq.f32.partialorder %v92_v52, %v95_v54 }
 0x5d3   :  { %v97_v55 = vsel %vm96_vm12, %v288_v3, 16 }
 0x5d4   :  { %v98_v56 = vsel %vm24_vm0, %v97_v55, 2147483647 }
 0x5d5   :  { %v100_v57 = vshra.s32 %v98_v56, 16  ;;  %v99_v59 = vand.u32 65535, %v98_v56 }
 0x5d7   :  { %v102_v58 = vcvt.s32.f32 %v100_v57  ;;  %v101_v61 = vcvt.s32.f32 %v99_v59 }
 0x5d9   :  { %103 = vmin.xlane.f32.xlu0 %v102_v58 }
 0x666   :  { %v104_v60 = vpop.xlane.xlu0 %103 }
 0x667   :  { %vm105_vm13 = vcmp.eq.f32.partialorder %v102_v58, %v104_v60  ;;  %v110_v63 = vcvt.f32.s32 %v104_v60 }
 0x668   :  { %v106_v62 = vsel %vm105_vm13, %v101_v61, inf  ;;  %vm189_vm13 = vcmask 23552  }
 0x669   :  { %107 = vmin.xlane.f32.xlu1 %v106_v62  ;;  %v111_v1 = vshll.u32 %v110_v63, 16 }
 0x6f6   :  { %v108_v0 = vpop.xlane.xlu1 %107 }
 0x6f7   :  { %v109_v2 = vcvt.f32.s32 %v108_v0 }
 0x6f9   :  { %v112_v4 = vadd.s32 %v111_v1, %v109_v2 }
 0x6fb   :  { %vm113_vm14 = vcmp.eq.s32.totalorder %v288_v3, %v112_v4 }
 0x6fc   :  { %vm329_vm15 = vmor %vm316_vm11, %vm113_vm14  ;;  %vm193_vm14 = vcmask 25600  }
 0x6fd   :  { %v115_v6 = vsel %vm329_vm15, %v288_v3, 16 }
 0x6fe   :  { %v116_v7 = vsel %vm24_vm0, %v115_v6, 2147483647 }
 0x6ff   :  { %v118_v8 = vshra.s32 %v116_v7, 16  ;;  %v117_v10 = vand.u32 65535, %v116_v7 }
 0x701   :  { %v120_v9 = vcvt.s32.f32 %v118_v8  ;;  %v119_v12 = vcvt.s32.f32 %v117_v10 }
 0x703   :  { %121 = vmin.xlane.f32.xlu0 %v120_v9 }
 0x790   :  { %v122_v11 = vpop.xlane.xlu0 %121 }
 0x791   :  { %vm123_vm1 = vcmp.eq.f32.partialorder %v120_v9, %v122_v11  ;;  %v128_v14 = vcvt.f32.s32 %v122_v11 }
 0x792   :  { %v124_v13 = vsel %vm123_vm1, %v119_v12, inf }
 0x793   :  { %125 = vmin.xlane.f32.xlu1 %v124_v13  ;;  %v129_v16 = vshll.u32 %v128_v14, 16 }
 0x820   :  { %v126_v15 = vpop.xlane.xlu1 %125 }
 0x821   :  { %v127_v17 = vcvt.f32.s32 %v126_v15 }
 0x823   :  { %v130_v18 = vadd.s32 %v129_v16, %v127_v17 }
 0x825   :  { %vm131_vm2 = vcmp.ne.s32.totalorder %v288_v3, %v130_v18 }
 0x826   :  { %vm340_vm3 = vmand %vm329_vm15, %vm131_vm2 }
 0x827   :  { %v133_v20 = vsel %vm340_vm3, %v288_v3, 16 }
 0x828   :  { %v134_v21 = vsel %vm24_vm0, %v133_v20, 2147483647 }
 0x829   :  { %v136_v22 = vshra.s32 %v134_v21, 16  ;;  %v135_v24 = vand.u32 65535, %v134_v21 }
 0x82b   :  { %v138_v23 = vcvt.s32.f32 %v136_v22  ;;  %v137_v26 = vcvt.s32.f32 %v135_v24 }
 0x82d   :  { %139 = vmin.xlane.f32.xlu0 %v138_v23 }
 0x8ba   :  { %v140_v25 = vpop.xlane.xlu0 %139 }
 0x8bb   :  { %vm141_vm4 = vcmp.eq.f32.partialorder %v138_v23, %v140_v25  ;;  %v146_v28 = vcvt.f32.s32 %v140_v25 }
 0x8bc   :  { %v142_v27 = vsel %vm141_vm4, %v137_v26, inf }
 0x8bd   :  { %143 = vmin.xlane.f32.xlu1 %v142_v27  ;;  %v147_v30 = vshll.u32 %v146_v28, 16 }
 0x94a   :  { %v144_v29 = vpop.xlane.xlu1 %143 }
 0x94b   :  { %v145_v31 = vcvt.f32.s32 %v144_v29 }
 0x94d   :  { %v148_v32 = vadd.s32 %v147_v30, %v145_v31 }
 0x94f   :  { %vm149_vm5 = vcmp.ne.s32.totalorder %v288_v3, %v148_v32  ;;  %v186_v47 = vsel %vm185_vm8, %v130_v18, %v148_v32 }
 0x950   :  { %vm351_vm6 = vmand %vm340_vm3, %vm149_vm5 }
 0x951   :  { %v151_v34 = vsel %vm351_vm6, %v288_v3, 16 }
 0x952   :  { %v152_v35 = vsel %vm24_vm0, %v151_v34, 2147483647 }
 0x953   :  { %v154_v36 = vshra.s32 %v152_v35, 16  ;;  %v153_v38 = vand.u32 65535, %v152_v35 }
 0x955   :  { %v156_v37 = vcvt.s32.f32 %v154_v36  ;;  %v155_v40 = vcvt.s32.f32 %v153_v38 }
 0x957   :  { %157 = vmin.xlane.f32.xlu0 %v156_v37 }
 0x9e4   :  { %v158_v39 = vpop.xlane.xlu0 %157 }
 0x9e5   :  { %vm159_vm7 = vcmp.eq.f32.partialorder %v156_v37, %v158_v39  ;;  %v164_v42 = vcvt.f32.s32 %v158_v39 }
 0x9e6   :  { %v160_v41 = vsel %vm159_vm7, %v155_v40, inf }
 0x9e7   :  { %161 = vmin.xlane.f32.xlu1 %v160_v41  ;;  %v165_v44 = vshll.u32 %v164_v42, 16 }
 0xa74   :  { %v162_v43 = vpop.xlane.xlu1 %161 }
 0xa75   :  { %v163_v45 = vcvt.f32.s32 %v162_v43 }
 0xa77   :  { %v166_v46 = vadd.s32 %v165_v44, %v163_v45 }
 0xa79   :  { %vm167_vm10 = vcmp.ne.s32.totalorder %v288_v3, %v166_v46  ;;  %v188_v48 = vsel %vm187_vm9, %v186_v47, %v166_v46 }
 0xa7a   :  { %vm168_vm11 = vmand %vm351_vm6, %vm167_vm10 }
 0xa7b   :  { %v169_v49 = vsel %vm168_vm11, %v288_v3, 16 }
 0xa7c   :  { %v170_v50 = vsel %vm24_vm0, %v169_v49, 2147483647 }
 0xa7d   :  { %v172_v51 = vshra.s32 %v170_v50, 16  ;;  %v171_v53 = vand.u32 65535, %v170_v50 }
 0xa7f   :  { %v174_v52 = vcvt.s32.f32 %v172_v51  ;;  %v173_v55 = vcvt.s32.f32 %v171_v53 }
 0xa81   :  { %175 = vmin.xlane.f32.xlu0 %v174_v52 }
 0xb0e   :  { %v176_v54 = vpop.xlane.xlu0 %175 }
 0xb0f   :  { %vm177_vm12 = vcmp.eq.f32.partialorder %v174_v52, %v176_v54  ;;  %v182_v57 = vcvt.f32.s32 %v176_v54 }
 0xb10   :  { %v178_v56 = vsel %vm177_vm12, %v173_v55, inf }
 0xb11   :  { %179 = vmin.xlane.f32.xlu1 %v178_v56  ;;  %v183_v59 = vshll.u32 %v182_v57, 16 }
 0xb9e   :  { %v180_v58 = vpop.xlane.xlu1 %179 }
 0xb9f   :  { %v181_v60 = vcvt.f32.s32 %v180_v58 }
 0xba1   :  { %v184_v61 = vadd.s32 %v183_v59, %v181_v60 }
 0xba3   :  { %v190_v3 = vsel %vm189_vm13, %v188_v48, %v184_v61 }
 0xba4   :  { %vm191_vm0 = vcmp.lt.s32.totalorder %v190_v3, 15 }
 0xba5   :  { %v192_v62 = vsel %vm191_vm0, %v190_v3, 15 }
 0xba6   :  { %194 = vst.msk [vmem:[#allocation5] sm:$0x3] %vm193_vm14, %v192_v62 }
 0xba7   :  { %245 = shalt.err (!%p242_p12)
}
 0xba8   :  { %s246_s22 = scalar_lea.hbm %s377_s1, 32 }
 0xba9   :  { %p247_p13 = scmp.ne.s32.totalorder %s377_s1, %s246_s22  ;;  %p250_p0 = scmp.lt.u32.totalorder %s246_s22, %s377_s1 }
 0xbab   :  { %p252_p1 = pnand %p250_p0, %p247_p13 }
 0xbad   :  { %255 = shalt.err (!%p252_p1)
}
 0xbae   :  { %204 = dma.vmem_to_hbm [thread:$0]  %s202_s18, 32, %s377_s1, [#allocation4]  }
 0xbaf   :  { %258 = dma.done.wait [#allocation4], 32  }
 0xbb0   :  { %259 = vsyncadd [#allocation4], 4294967264 }
 0xbb1   :  { %208 = vsyncpa [#allocation3], 1 }
 0xbb2   :  { %209 = vsyncpa [#allocation4], 1 }

</bundles_post_ra>
